<compile_context>
chip_gen: v5e
topology: v5e:2x2
jax: 0.10.0
libtpu: 0.0.40
codegen_flags: <defaults>
</compile_context>

<pallas_src>
import jax
import jax.numpy as jnp
from jax.experimental import pallas as pl
from jax.experimental.pallas import tpu as pltpu

EPS = 1e-5  # PyTorch BatchNorm2d default eps


# -----------------------------------------------------------------------------
# Parameter setup (matches the PyTorch module's init)
# -----------------------------------------------------------------------------
def init_params(key, c_in, c_out, kernel_size=9):
    # conv_init: kaiming_normal(mode='fan_out') on (C_out, C_in, K, 1); bias = 0.
    fan_out = c_out * kernel_size * 1
    w = jax.random.normal(key, (c_out, c_in, kernel_size), jnp.float32) * jnp.sqrt(2.0 / fan_out)
    return dict(
        w=w,                                        # (C_out, C_in, K) temporal conv weight
        b=jnp.zeros((c_out,), jnp.float32),         # conv bias (conv_init -> 0)
        bn_gamma=jnp.ones((c_out,), jnp.float32),   # bn_init(bn, 1)
        bn_beta=jnp.zeros((c_out,), jnp.float32),
    )


# -----------------------------------------------------------------------------
# Fused conv + BN kernel (built per-shape; grid iterates over batch blocks)
# -----------------------------------------------------------------------------
def _make_tcn_kernel(n, c_out, k_sz, stride, t_out, v_dim, t_res, batch_block):
    tv = t_out * v_dim
    count = float(n * tv)  # BN normalizes over (N, T_out, V)

    def kernel(x_ref, w_ref, g_ref, beta_ref, out_ref, sum_sc, sq_sc):
        # x_ref:   (batch_block, C_in, stride*t_res*V)  bf16 resident input slab
        # w_ref:   (K, C_out, C_in)                      bf16 conv weight
        # g_ref:   (C_out, 1) f32  bn gamma
        # beta_ref:(C_out, 1) f32  bn beta
        # out_ref: (N, C_out, T_out*V) f32  -- resident across the whole grid
        # sum_sc / sq_sc: (C_out, 1) f32 VMEM scratch, persist across grid steps
        blk = pl.program_id(0)

        @pl.when(blk == 0)
        def _():
            sum_sc[...] = jnp.zeros_like(sum_sc)
            sq_sc[...] = jnp.zeros_like(sq_sc)

        for nb in range(batch_block):  # static unroll (small)
            acc = jnp.zeros((c_out, tv), jnp.float32)
            for k in range(k_sz):      # K accumulating MXU dots; taps via pl.ds windows
                off = (k % stride) * t_res * v_dim + (k // stride) * v_dim
                win = x_ref[nb, :, pl.ds(off, tv)]            # (C_in, T_out*V)
                acc = acc + jnp.dot(w_ref[k], win,
                                    preferred_element_type=jnp.float32)
            out_ref[blk * batch_block + nb] = acc             # stays in VMEM (resident block)
            sum_sc[...] += jnp.sum(acc, axis=1, keepdims=True)
            sq_sc[...] += jnp.sum(acc * acc, axis=1, keepdims=True)

        @pl.when(blk == pl.num_programs(0) - 1)
        def _():
            mean = sum_sc[...] / count
            var = jnp.maximum(sq_sc[...] / count - mean * mean, 0.0)  # biased, as PyTorch BN
            inv = jax.lax.rsqrt(var + EPS)
            scale = g_ref[...] * inv
            shift = beta_ref[...] - mean * scale
            # In-place BN affine on the resident activation; single HBM writeback follows.
            out_ref[...] = out_ref[...] * scale[None] + shift[None]

    return kernel


# -----------------------------------------------------------------------------
# Forward wrapper
# -----------------------------------------------------------------------------
def tcn_forward(x, params, stride=1, batch_block=1, matmul_dtype=jnp.bfloat16):
    n, c_in, t_in, v_dim = x.shape
    w = params["w"]
    c_out, _, k_sz = w.shape
    pad = (k_sz - 1) // 2
    t_out = (t_in + 2 * pad - k_sz) // stride + 1
    tv = t_out * v_dim
    t_res = (k_sz - 1) // stride + t_out  # rows per stride-residue slab
    assert n % batch_block == 0

    # Layout plumbing (XLA, one pass over the small input): zero-pad T once, split into
    # `stride` residue classes (identity for stride=1) and flatten so every temporal tap
    # is a contiguous lane window inside the kernel.
    x_pad = jnp.pad(x, ((0, 0), (0, 0), (pad, pad), (0, 0)))
    slabs = []
    for r in range(stride):
        xr = x_pad[:, :, r::stride, :]
        if xr.shape[2] < t_res:
            xr = jnp.pad(xr, ((0, 0), (0, 0), (0, t_res - xr.shape[2]), (0, 0)))
        else:
            xr = xr[:, :, :t_res, :]
        slabs.append(xr)
    lane = stride * t_res * v_dim
    x_flat = jnp.stack(slabs, axis=2).reshape(n, c_in, lane).astype(matmul_dtype)

    w_t = jnp.transpose(w, (2, 0, 1)).astype(matmul_dtype)          # (K, C_out, C_in)
    gamma = params["bn_gamma"].reshape(c_out, 1).astype(jnp.float32)
    beta = params["bn_beta"].reshape(c_out, 1).astype(jnp.float32)
    # Conv bias is dropped: train-mode BatchNorm subtracts the batch mean, which exactly
    # cancels any per-channel constant (and it is zero-initialized in the module anyway).

    kernel = _make_tcn_kernel(n, c_out, k_sz, stride, t_out, v_dim, t_res, batch_block)

    out = pl.pallas_call(
        kernel,
        out_shape=jax.ShapeDtypeStruct((n, c_out, tv), jnp.float32),
        grid=(n // batch_block,),
        in_specs=[
            pl.BlockSpec((batch_block, c_in, lane), lambda i: (i, 0, 0)),
            pl.BlockSpec((k_sz, c_out, c_in), lambda i: (0, 0, 0)),
            pl.BlockSpec((c_out, 1), lambda i: (0, 0)),
            pl.BlockSpec((c_out, 1), lambda i: (0, 0)),
        ],
        # Constant block index -> output stays resident in VMEM across all grid steps
        # (written back to HBM once, after the BN affine in the last step).
        out_specs=pl.BlockSpec((n, c_out, tv), lambda i: (0, 0, 0)),
        scratch_shapes=[
            pltpu.VMEM((c_out, 1), jnp.float32),
            pltpu.VMEM((c_out, 1), jnp.float32),
        ],
        compiler_params=pltpu.CompilerParams(
            dimension_semantics=("arbitrary",),  # batch axis carries BN stats + resident output
        ),
    )(x_flat, w_t, gamma, beta)

    return out.reshape(n, c_out, t_out, v_dim)


# -----------------------------------------------------------------------------
# Pure-JAX reference for validation
# -----------------------------------------------------------------------------
def tcn_forward_ref(x, params, stride=1):
    w4 = params["w"][..., None]                               # (C_out, C_in, K, 1)
    k_sz = params["w"].shape[-1]
    pad = (k_sz - 1) // 2
    y = jax.lax.conv_general_dilated(
        x, w4, window_strides=(stride, 1), padding=((pad, pad), (0, 0)),
        dimension_numbers=("NCHW", "OIHW", "NCHW"))
    y = y + params["b"][None, :, None, None]
    m = y.mean(axis=(0, 2, 3), keepdims=True)
    v = y.var(axis=(0, 2, 3), keepdims=True)
    return ((y - m) * jax.lax.rsqrt(v + EPS) * params["bn_gamma"][None, :, None, None]
            + params["bn_beta"][None, :, None, None])


# -----------------------------------------------------------------------------
if __name__ == "__main__":
    key = jax.random.PRNGKey(0)
    kx, kp = jax.random.split(key)

    N, C_IN, C_OUT, T, V = 2, 4, 8, 16, 16
    STRIDE = 1

    x = jax.random.normal(kx, (N, C_IN, T, V), jnp.float32)
    params = init_params(kp, C_IN, C_OUT, kernel_size=9)

    out = jax.block_until_ready(tcn_forward(x, params, stride=STRIDE))
    ref = tcn_forward_ref(x, params, stride=STRIDE)

    assert out.shape == (N, C_OUT, T // STRIDE, V), out.shape
    # bf16 matmul operands (f32 accumulation) -> slightly looser tolerance than pure f32.
    if not bool(jnp.allclose(out, ref, atol=3e-2, rtol=3e-2)):
        raise AssertionError("Pallas tcn output does not match JAX reference")

    print("KERNEL_OK")
</pallas_src>

<mosaic_0001>
module attributes {stable_mosaic.version = 11 : i64} {
  func.func @kernel(%arg0: i32, %arg1: memref<1x4x384xbf16, #tpu.memory_space<vmem>>, %arg2: memref<9x8x4xbf16, #tpu.memory_space<vmem>>, %arg3: memref<8x1xf32, #tpu.memory_space<vmem>>, %arg4: memref<8x1xf32, #tpu.memory_space<vmem>>, %arg5: memref<2x8x256xf32, #tpu.memory_space<vmem>>, %arg6: memref<8x1xf32, #tpu.memory_space<vmem>>, %arg7: memref<8x1xf32, #tpu.memory_space<vmem>>) attributes {dimension_semantics = [#tpu.dimension_semantics<arbitrary>], iteration_bounds = array<i64: 2>, scalar_prefetch = 0 : i64, scratch_operands = 2 : i64, tpu.core_type = #tpu.core_type<tc>, window_params = [{transform_indices = @transform_0, window_bounds = array<i64: 1, 4, 384>}, {pipeline_mode = #tpu.pipeline_mode<synchronous>, transform_indices = @transform_1, window_bounds = array<i64: 9, 8, 4>}, {pipeline_mode = #tpu.pipeline_mode<synchronous>, transform_indices = @transform_2, window_bounds = array<i64: 8, 1>}, {pipeline_mode = #tpu.pipeline_mode<synchronous>, transform_indices = @transform_3, window_bounds = array<i64: 8, 1>}, {pipeline_mode = #tpu.pipeline_mode<synchronous>, transform_indices = @transform_4, window_bounds = array<i64: 2, 8, 256>}]} {
    %c0_i32 = arith.constant 0 : i32
    %0 = arith.cmpi eq, %arg0, %c0_i32 : i32
    %1 = arith.extui %0 : i1 to i32
    %c0_i32_0 = arith.constant 0 : i32
    %2 = arith.cmpi ne, %1, %c0_i32_0 : i32
    scf.if %2 {
      %cst_62 = arith.constant 0.000000e+00 : f32
      %78 = vector.broadcast %cst_62 : f32 to vector<8x1xf32>
      %c0_63 = arith.constant 0 : index
      %c0_64 = arith.constant 0 : index
      %79 = vector.load %arg6[%c0_63, %c0_64] : memref<8x1xf32, #tpu.memory_space<vmem>>, vector<8x1xf32>
      tpu.vector_store %arg6[%c0_63, %c0_64], %78 {strides = array<i32>} : memref<8x1xf32, #tpu.memory_space<vmem>>, vector<8x1xf32>,
      %cst_65 = arith.constant 0.000000e+00 : f32
      %80 = vector.broadcast %cst_65 : f32 to vector<8x1xf32>
      %c0_66 = arith.constant 0 : index
      %c0_67 = arith.constant 0 : index
      %81 = vector.load %arg7[%c0_66, %c0_67] : memref<8x1xf32, #tpu.memory_space<vmem>>, vector<8x1xf32>
      tpu.vector_store %arg7[%c0_66, %c0_67], %80 {strides = array<i32>} : memref<8x1xf32, #tpu.memory_space<vmem>>, vector<8x1xf32>,
    } else {
    }
    %cst = arith.constant 0.000000e+00 : f32
    %3 = vector.broadcast %cst : f32 to vector<8x256xf32>
    %c0 = arith.constant 0 : index
    %c0_1 = arith.constant 0 : index
    %c0_2 = arith.constant 0 : index
    %4 = vector.load %arg1[%c0, %c0_1, %c0_2] : memref<1x4x384xbf16, #tpu.memory_space<vmem>>, vector<1x4x256xbf16>
    %5 = vector.shape_cast %4 : vector<1x4x256xbf16> to vector<4x256xbf16>
    %c0_3 = arith.constant 0 : index
    %c0_4 = arith.constant 0 : index
    %c0_5 = arith.constant 0 : index
    %6 = vector.load %arg2[%c0_3, %c0_4, %c0_5] : memref<9x8x4xbf16, #tpu.memory_space<vmem>>, vector<1x8x4xbf16>
    %7 = vector.shape_cast %6 : vector<1x8x4xbf16> to vector<8x4xbf16>
    %cst_6 = arith.constant dense<0.000000e+00> : vector<8x256xf32>
    %8 = tpu.matmul %7, %5, %cst_6 {dimension_numbers = #tpu.dot_dimension_numbers<[1], [0], [0], [1], [0, 0, 1, 1], [], []>} : vector<8x4xbf16>, vector<4x256xbf16>, vector<8x256xf32> -> vector<8x256xf32>
    %9 = arith.addf %3, %8 : vector<8x256xf32>
    %c0_7 = arith.constant 0 : index
    %c0_8 = arith.constant 0 : index
    %c16 = arith.constant 16 : index
    %10 = vector.load %arg1[%c0_7, %c0_8, %c16] : memref<1x4x384xbf16, #tpu.memory_space<vmem>>, vector<1x4x256xbf16>
    %11 = vector.shape_cast %10 : vector<1x4x256xbf16> to vector<4x256xbf16>
    %c1 = arith.constant 1 : index
    %c0_9 = arith.constant 0 : index
    %c0_10 = arith.constant 0 : index
    %12 = vector.load %arg2[%c1, %c0_9, %c0_10] : memref<9x8x4xbf16, #tpu.memory_space<vmem>>, vector<1x8x4xbf16>
    %13 = vector.shape_cast %12 : vector<1x8x4xbf16> to vector<8x4xbf16>
    %cst_11 = arith.constant dense<0.000000e+00> : vector<8x256xf32>
    %14 = tpu.matmul %13, %11, %cst_11 {dimension_numbers = #tpu.dot_dimension_numbers<[1], [0], [0], [1], [0, 0, 1, 1], [], []>} : vector<8x4xbf16>, vector<4x256xbf16>, vector<8x256xf32> -> vector<8x256xf32>
    %15 = arith.addf %9, %14 : vector<8x256xf32>
    %c0_12 = arith.constant 0 : index
    %c0_13 = arith.constant 0 : index
    %c32 = arith.constant 32 : index
    %16 = vector.load %arg1[%c0_12, %c0_13, %c32] : memref<1x4x384xbf16, #tpu.memory_space<vmem>>, vector<1x4x256xbf16>
    %17 = vector.shape_cast %16 : vector<1x4x256xbf16> to vector<4x256xbf16>
    %c2 = arith.constant 2 : index
    %c0_14 = arith.constant 0 : index
    %c0_15 = arith.constant 0 : index
    %18 = vector.load %arg2[%c2, %c0_14, %c0_15] : memref<9x8x4xbf16, #tpu.memory_space<vmem>>, vector<1x8x4xbf16>
    %19 = vector.shape_cast %18 : vector<1x8x4xbf16> to vector<8x4xbf16>
    %cst_16 = arith.constant dense<0.000000e+00> : vector<8x256xf32>
    %20 = tpu.matmul %19, %17, %cst_16 {dimension_numbers = #tpu.dot_dimension_numbers<[1], [0], [0], [1], [0, 0, 1, 1], [], []>} : vector<8x4xbf16>, vector<4x256xbf16>, vector<8x256xf32> -> vector<8x256xf32>
    %21 = arith.addf %15, %20 : vector<8x256xf32>
    %c0_17 = arith.constant 0 : index
    %c0_18 = arith.constant 0 : index
    %c48 = arith.constant 48 : index
    %22 = vector.load %arg1[%c0_17, %c0_18, %c48] : memref<1x4x384xbf16, #tpu.memory_space<vmem>>, vector<1x4x256xbf16>
    %23 = vector.shape_cast %22 : vector<1x4x256xbf16> to vector<4x256xbf16>
    %c3 = arith.constant 3 : index
    %c0_19 = arith.constant 0 : index
    %c0_20 = arith.constant 0 : index
    %24 = vector.load %arg2[%c3, %c0_19, %c0_20] : memref<9x8x4xbf16, #tpu.memory_space<vmem>>, vector<1x8x4xbf16>
    %25 = vector.shape_cast %24 : vector<1x8x4xbf16> to vector<8x4xbf16>
    %cst_21 = arith.constant dense<0.000000e+00> : vector<8x256xf32>
    %26 = tpu.matmul %25, %23, %cst_21 {dimension_numbers = #tpu.dot_dimension_numbers<[1], [0], [0], [1], [0, 0, 1, 1], [], []>} : vector<8x4xbf16>, vector<4x256xbf16>, vector<8x256xf32> -> vector<8x256xf32>
    %27 = arith.addf %21, %26 : vector<8x256xf32>
    %c0_22 = arith.constant 0 : index
    %c0_23 = arith.constant 0 : index
    %c64 = arith.constant 64 : index
    %28 = vector.load %arg1[%c0_22, %c0_23, %c64] : memref<1x4x384xbf16, #tpu.memory_space<vmem>>, vector<1x4x256xbf16>
    %29 = vector.shape_cast %28 : vector<1x4x256xbf16> to vector<4x256xbf16>
    %c4 = arith.constant 4 : index
    %c0_24 = arith.constant 0 : index
    %c0_25 = arith.constant 0 : index
    %30 = vector.load %arg2[%c4, %c0_24, %c0_25] : memref<9x8x4xbf16, #tpu.memory_space<vmem>>, vector<1x8x4xbf16>
    %31 = vector.shape_cast %30 : vector<1x8x4xbf16> to vector<8x4xbf16>
    %cst_26 = arith.constant dense<0.000000e+00> : vector<8x256xf32>
    %32 = tpu.matmul %31, %29, %cst_26 {dimension_numbers = #tpu.dot_dimension_numbers<[1], [0], [0], [1], [0, 0, 1, 1], [], []>} : vector<8x4xbf16>, vector<4x256xbf16>, vector<8x256xf32> -> vector<8x256xf32>
    %33 = arith.addf %27, %32 : vector<8x256xf32>
    %c0_27 = arith.constant 0 : index
    %c0_28 = arith.constant 0 : index
    %c80 = arith.constant 80 : index
    %34 = vector.load %arg1[%c0_27, %c0_28, %c80] : memref<1x4x384xbf16, #tpu.memory_space<vmem>>, vector<1x4x256xbf16>
    %35 = vector.shape_cast %34 : vector<1x4x256xbf16> to vector<4x256xbf16>
    %c5 = arith.constant 5 : index
    %c0_29 = arith.constant 0 : index
    %c0_30 = arith.constant 0 : index
    %36 = vector.load %arg2[%c5, %c0_29, %c0_30] : memref<9x8x4xbf16, #tpu.memory_space<vmem>>, vector<1x8x4xbf16>
    %37 = vector.shape_cast %36 : vector<1x8x4xbf16> to vector<8x4xbf16>
    %cst_31 = arith.constant dense<0.000000e+00> : vector<8x256xf32>
    %38 = tpu.matmul %37, %35, %cst_31 {dimension_numbers = #tpu.dot_dimension_numbers<[1], [0], [0], [1], [0, 0, 1, 1], [], []>} : vector<8x4xbf16>, vector<4x256xbf16>, vector<8x256xf32> -> vector<8x256xf32>
    %39 = arith.addf %33, %38 : vector<8x256xf32>
    %c0_32 = arith.constant 0 : index
    %c0_33 = arith.constant 0 : index
    %c96 = arith.constant 96 : index
    %40 = vector.load %arg1[%c0_32, %c0_33, %c96] : memref<1x4x384xbf16, #tpu.memory_space<vmem>>, vector<1x4x256xbf16>
    %41 = vector.shape_cast %40 : vector<1x4x256xbf16> to vector<4x256xbf16>
    %c6 = arith.constant 6 : index
    %c0_34 = arith.constant 0 : index
    %c0_35 = arith.constant 0 : index
    %42 = vector.load %arg2[%c6, %c0_34, %c0_35] : memref<9x8x4xbf16, #tpu.memory_space<vmem>>, vector<1x8x4xbf16>
    %43 = vector.shape_cast %42 : vector<1x8x4xbf16> to vector<8x4xbf16>
    %cst_36 = arith.constant dense<0.000000e+00> : vector<8x256xf32>
    %44 = tpu.matmul %43, %41, %cst_36 {dimension_numbers = #tpu.dot_dimension_numbers<[1], [0], [0], [1], [0, 0, 1, 1], [], []>} : vector<8x4xbf16>, vector<4x256xbf16>, vector<8x256xf32> -> vector<8x256xf32>
    %45 = arith.addf %39, %44 : vector<8x256xf32>
    %c0_37 = arith.constant 0 : index
    %c0_38 = arith.constant 0 : index
    %c112 = arith.constant 112 : index
    %46 = vector.load %arg1[%c0_37, %c0_38, %c112] : memref<1x4x384xbf16, #tpu.memory_space<vmem>>, vector<1x4x256xbf16>
    %47 = vector.shape_cast %46 : vector<1x4x256xbf16> to vector<4x256xbf16>
    %c7 = arith.constant 7 : index
    %c0_39 = arith.constant 0 : index
    %c0_40 = arith.constant 0 : index
    %48 = vector.load %arg2[%c7, %c0_39, %c0_40] : memref<9x8x4xbf16, #tpu.memory_space<vmem>>, vector<1x8x4xbf16>
    %49 = vector.shape_cast %48 : vector<1x8x4xbf16> to vector<8x4xbf16>
    %cst_41 = arith.constant dense<0.000000e+00> : vector<8x256xf32>
    %50 = tpu.matmul %49, %47, %cst_41 {dimension_numbers = #tpu.dot_dimension_numbers<[1], [0], [0], [1], [0, 0, 1, 1], [], []>} : vector<8x4xbf16>, vector<4x256xbf16>, vector<8x256xf32> -> vector<8x256xf32>
    %51 = arith.addf %45, %50 : vector<8x256xf32>
    %c0_42 = arith.constant 0 : index
    %c0_43 = arith.constant 0 : index
    %c128 = arith.constant 128 : index
    %52 = vector.load %arg1[%c0_42, %c0_43, %c128] : memref<1x4x384xbf16, #tpu.memory_space<vmem>>, vector<1x4x256xbf16>
    %53 = vector.shape_cast %52 : vector<1x4x256xbf16> to vector<4x256xbf16>
    %c8 = arith.constant 8 : index
    %c0_44 = arith.constant 0 : index
    %c0_45 = arith.constant 0 : index
    %54 = vector.load %arg2[%c8, %c0_44, %c0_45] : memref<9x8x4xbf16, #tpu.memory_space<vmem>>, vector<1x8x4xbf16>
    %55 = vector.shape_cast %54 : vector<1x8x4xbf16> to vector<8x4xbf16>
    %cst_46 = arith.constant dense<0.000000e+00> : vector<8x256xf32>
    %56 = tpu.matmul %55, %53, %cst_46 {dimension_numbers = #tpu.dot_dimension_numbers<[1], [0], [0], [1], [0, 0, 1, 1], [], []>} : vector<8x4xbf16>, vector<4x256xbf16>, vector<8x256xf32> -> vector<8x256xf32>
    %57 = arith.addf %51, %56 : vector<8x256xf32>
    %c1_i32 = arith.constant 1 : i32
    %58 = arith.muli %arg0, %c1_i32 : i32
    %c0_i32_47 = arith.constant 0 : i32
    %59 = arith.addi %58, %c0_i32_47 : i32
    %60 = arith.index_cast %59 : i32 to index
    %c0_48 = arith.constant 0 : index
    %c0_49 = arith.constant 0 : index
    %61 = vector.load %arg5[%60, %c0_48, %c0_49] : memref<2x8x256xf32, #tpu.memory_space<vmem>>, vector<1x8x256xf32>
    %62 = vector.shape_cast %61 : vector<1x8x256xf32> to vector<8x256xf32>
    %63 = vector.shape_cast %57 : vector<8x256xf32> to vector<1x8x256xf32>
    tpu.vector_store %arg5[%60, %c0_48, %c0_49], %63 {strides = array<i32>} : memref<2x8x256xf32, #tpu.memory_space<vmem>>, vector<1x8x256xf32>,
    %c0_50 = arith.constant 0 : index
    %c0_51 = arith.constant 0 : index
    %64 = vector.load %arg6[%c0_50, %c0_51] : memref<8x1xf32, #tpu.memory_space<vmem>>, vector<8x1xf32>
    %cst_52 = arith.constant dense<0.000000e+00> : vector<8xf32>
    %65 = vector.multi_reduction <add>, %57, %cst_52 [1] : vector<8x256xf32> to vector<8xf32>
    %66 = vector.shape_cast %65 : vector<8xf32> to vector<8x1xf32>
    %67 = arith.addf %64, %66 : vector<8x1xf32>
    %c0_53 = arith.constant 0 : index
    %c0_54 = arith.constant 0 : index
    %68 = vector.load %arg6[%c0_53, %c0_54] : memref<8x1xf32, #tpu.memory_space<vmem>>, vector<8x1xf32>
    tpu.vector_store %arg6[%c0_53, %c0_54], %67 {strides = array<i32>} : memref<8x1xf32, #tpu.memory_space<vmem>>, vector<8x1xf32>,
    %c0_55 = arith.constant 0 : index
    %c0_56 = arith.constant 0 : index
    %69 = vector.load %arg7[%c0_55, %c0_56] : memref<8x1xf32, #tpu.memory_space<vmem>>, vector<8x1xf32>
    %70 = arith.mulf %57, %57 : vector<8x256xf32>
    %cst_57 = arith.constant dense<0.000000e+00> : vector<8xf32>
    %71 = vector.multi_reduction <add>, %70, %cst_57 [1] : vector<8x256xf32> to vector<8xf32>
    %72 = vector.shape_cast %71 : vector<8xf32> to vector<8x1xf32>
    %73 = arith.addf %69, %72 : vector<8x1xf32>
    %c0_58 = arith.constant 0 : index
    %c0_59 = arith.constant 0 : index
    %74 = vector.load %arg7[%c0_58, %c0_59] : memref<8x1xf32, #tpu.memory_space<vmem>>, vector<8x1xf32>
    tpu.vector_store %arg7[%c0_58, %c0_59], %73 {strides = array<i32>} : memref<8x1xf32, #tpu.memory_space<vmem>>, vector<8x1xf32>,
    %c1_i32_60 = arith.constant 1 : i32
    %75 = arith.cmpi eq, %arg0, %c1_i32_60 : i32
    %76 = arith.extui %75 : i1 to i32
    %c0_i32_61 = arith.constant 0 : i32
    %77 = arith.cmpi ne, %76, %c0_i32_61 : i32
    scf.if %77 {
      %c0_62 = arith.constant 0 : index
      %c0_63 = arith.constant 0 : index
      %78 = vector.load %arg6[%c0_62, %c0_63] : memref<8x1xf32, #tpu.memory_space<vmem>>, vector<8x1xf32>
      %cst_64 = arith.constant 5.120000e+02 : f32
      %79 = vector.broadcast %cst_64 : f32 to vector<8x1xf32>
      %80 = arith.divf %78, %79 : vector<8x1xf32>
      %c0_65 = arith.constant 0 : index
      %c0_66 = arith.constant 0 : index
      %81 = vector.load %arg7[%c0_65, %c0_66] : memref<8x1xf32, #tpu.memory_space<vmem>>, vector<8x1xf32>
      %cst_67 = arith.constant 5.120000e+02 : f32
      %82 = vector.broadcast %cst_67 : f32 to vector<8x1xf32>
      %83 = arith.divf %81, %82 : vector<8x1xf32>
      %84 = arith.mulf %80, %80 : vector<8x1xf32>
      %85 = arith.subf %83, %84 : vector<8x1xf32>
      %cst_68 = arith.constant 0.000000e+00 : f32
      %86 = vector.broadcast %cst_68 : f32 to vector<8x1xf32>
      %87 = arith.maximumf %85, %86 : vector<8x1xf32>
      %cst_69 = arith.constant 9.99999974E-6 : f32
      %88 = vector.broadcast %cst_69 : f32 to vector<8x1xf32>
      %89 = arith.addf %87, %88 : vector<8x1xf32>
      %90 = math.rsqrt %89 : vector<8x1xf32>
      %c0_70 = arith.constant 0 : index
      %c0_71 = arith.constant 0 : index
      %91 = vector.load %arg3[%c0_70, %c0_71] : memref<8x1xf32, #tpu.memory_space<vmem>>, vector<8x1xf32>
      %92 = arith.mulf %91, %90 : vector<8x1xf32>
      %c0_72 = arith.constant 0 : index
      %c0_73 = arith.constant 0 : index
      %93 = vector.load %arg4[%c0_72, %c0_73] : memref<8x1xf32, #tpu.memory_space<vmem>>, vector<8x1xf32>
      %94 = arith.mulf %80, %92 : vector<8x1xf32>
      %95 = arith.subf %93, %94 : vector<8x1xf32>
      %c0_74 = arith.constant 0 : index
      %c0_75 = arith.constant 0 : index
      %c0_76 = arith.constant 0 : index
      %96 = vector.load %arg5[%c0_74, %c0_75, %c0_76] : memref<2x8x256xf32, #tpu.memory_space<vmem>>, vector<2x8x256xf32>
      %97 = vector.shape_cast %92 : vector<8x1xf32> to vector<1x8x1xf32>
      %98 = vector.broadcast %97 : vector<1x8x1xf32> to vector<2x8x256xf32>
      %99 = arith.mulf %96, %98 : vector<2x8x256xf32>
      %100 = vector.shape_cast %95 : vector<8x1xf32> to vector<1x8x1xf32>
      %101 = vector.broadcast %100 : vector<1x8x1xf32> to vector<2x8x256xf32>
      %102 = arith.addf %99, %101 : vector<2x8x256xf32>
      %c0_77 = arith.constant 0 : index
      %c0_78 = arith.constant 0 : index
      %c0_79 = arith.constant 0 : index
      %103 = vector.load %arg5[%c0_77, %c0_78, %c0_79] : memref<2x8x256xf32, #tpu.memory_space<vmem>>, vector<2x8x256xf32>
      tpu.vector_store %arg5[%c0_77, %c0_78, %c0_79], %102 {strides = array<i32>} : memref<2x8x256xf32, #tpu.memory_space<vmem>>, vector<2x8x256xf32>,
    } else {
    }
    return
  }
  func.func @transform_0(%arg0: i32) -> (i32, i32, i32) {
    %c0_i32 = arith.constant 0 : i32
    %c0_i32_0 = arith.constant 0 : i32
    %c0_i32_1 = arith.constant 0 : i32
    return %arg0, %c0_i32, %c0_i32_0 : i32, i32, i32
  }
  func.func @transform_1(%arg0: i32) -> (i32, i32, i32) {
    %c0_i32 = arith.constant 0 : i32
    %c0_i32_0 = arith.constant 0 : i32
    %c0_i32_1 = arith.constant 0 : i32
    %c0_i32_2 = arith.constant 0 : i32
    return %c0_i32, %c0_i32_0, %c0_i32_1 : i32, i32, i32
  }
  func.func @transform_2(%arg0: i32) -> (i32, i32) {
    %c0_i32 = arith.constant 0 : i32
    %c0_i32_0 = arith.constant 0 : i32
    %c0_i32_1 = arith.constant 0 : i32
    return %c0_i32, %c0_i32_0 : i32, i32
  }
  func.func @transform_3(%arg0: i32) -> (i32, i32) {
    %c0_i32 = arith.constant 0 : i32
    %c0_i32_0 = arith.constant 0 : i32
    %c0_i32_1 = arith.constant 0 : i32
    return %c0_i32, %c0_i32_0 : i32, i32
  }
  func.func @transform_4(%arg0: i32) -> (i32, i32, i32) {
    %c0_i32 = arith.constant 0 : i32
    %c0_i32_0 = arith.constant 0 : i32
    %c0_i32_1 = arith.constant 0 : i32
    %c0_i32_2 = arith.constant 0 : i32
    return %c0_i32, %c0_i32_0, %c0_i32_1 : i32, i32, i32
  }
}

</mosaic_0001>

<bundles_post_ra>
// kernel: tpu_custom_call.1
= control target key start
LH: loop header
LB: loop body
LE: loop exit
PB: predicated region body
PF: predicated region fallthrough
CT: control target
= control target key end

     0   :  { %9 = vsyncpa [#allocation5], 0  ;;  %s953_s15 = smov 0   ;;  %s1064_s0 = inlined_call_operand.vmem [shape: bf16[2,4,384], index: 0, kind: input, shape index: {}]   ;;  %s1065_s1 = inlined_call_operand.vmem [shape: bf16[9,8,4], index: 1, kind: input, shape index: {}]   ;;  %s1066_s2 = inlined_call_operand.vmem [shape: f32[8,1], index: 2, kind: input, shape index: {}]   ;;  %s1067_s3 = inlined_call_operand.vmem [shape: f32[8,1], index: 3, kind: input, shape index: {}]   ;;  %s1068_s4 = inlined_call_operand.hbm [shape: f32[2,8,256], index: 4, kind: output, shape index: {}]  }
   0x1 LB: > { %s959_s16 = sadd.s32 4294967295, %s914_s15   ;;  %p807_p0 = scmp.ge.s32.totalorder %s914_s15, 1  ;;  %s914_s15 = sphi %s953_s15, %s15_s15  }
   0x2   : > { %p158_p1 = scmp.lt.s32.totalorder %s914_s15, 3 }
   0x4   : > { %p159_p2 = pnand %p807_p0, %p158_p1 }
   0x5   : > { %p179_p3 = scmp.lt.s32.totalorder (!%p159_p2), %s959_s16, 1  ;;  %p809_p4 = scmp.ne.s32.totalorder (!%p159_p2), %s959_s16, 0 }
   0x6   : > { %162 = sbr.rel (%p159_p2) target bundleno = 655 (0x28f), region = 36 }
   0xb   : > { %s180_s17 = scalar_select %p179_p3, %s959_s16, 1 }
   0xc   : > { %188 = sbr.rel (%p809_p4) target bundleno = 20 (0x14), region = 40 }
   0xd   : > { %s844_s18 = smul.u32 6, %s180_s17 }
   0xf   : > { %s968_s21 = scalar_lea.vmem %s1064_s0, %s844_s18 }
  0x11   : > { %vm189_vm0 = vcmask 7168   ;;  %v916_v0 = vmov 0.0  }
  0x12   : > { %190 = vst.msk [vmem:[#allocation2] sm:$0xff] %vm189_vm0, %v916_v0 }
  0x13   : > { %191 = vst.msk [vmem:[#allocation3] sm:$0xff] %vm189_vm0, %v916_v0 }
  0x14 PF: > { %v194_v1 = vld [vmem:[%s968_s21] sm:$0x3f]  ;;  %s917_s22 = smov 112   ;;  %s918_s23 = smov 96   ;;  %vm218_vm1 = vcmask 1041408   ;;  %vm214_vm2 = vcmask 31744  }
  0x15   : > { %198 = vst [vmem:[#allocation1] ss:$4 sm:$0xff] %v194_v1  ;;  %v192_v2 = vld [vmem:[%s968_s21] sm:$0xf]  ;;  %s919_s24 = smov 80   ;;  %s920_s25 = smov 64  }
  0x16   : > { %v288_v6 = vld [vmem:[%s968_s21] sm:$0x3f]  ;;  %s921_s26 = smov 48   ;;  %s922_s27 = smov 32   ;;  %vm305_vm3 = vcmask 785408   ;;  %vm211_vm4 = vcmask 916480  }
  0x17   : > { %v345_v9 = vld [vmem:[%s968_s21] sm:$0x3f]  ;;  %s923_s28 = smov 16   ;;  %vm362_vm5 = vcmask 654336   ;;  %v815_v54 = vld [vmem:[%s1065_s1 + $0x8] sm:$0xf] }
  0x18   : > { %v402_v13 = vld [vmem:[%s968_s21] sm:$0x3f]  ;;  %v818_v58 = vld [vmem:[%s1065_s1 + $0xc] sm:$0xf]  ;;  %vm419_vm6 = vcmask 523264   ;;  %vm476_vm7 = vcmask 392192  }
  0x19   : > { %v459_v17 = vld [vmem:[%s968_s21] sm:$0x3f]  ;;  %vm533_vm8 = vcmask 261120   ;;  %vm590_vm9 = vcmask 130048   ;;  %vm682_vm10 = vcmask 7168   ;;  %p838_p5 = scmp.ne.s32.totalorder %s959_s16, 1 }
  0x1a   : > { %v516_v21 = vld [vmem:[%s968_s21] sm:$0x3f] }
  0x1b   : > { %v573_v25 = vld [vmem:[%s968_s21] sm:$0x3f] }
  0x1c   : > { %v199_v3 = vld.sshfl [vmem:[#allocation1] sm:$0xff pattern:$0x73625140]  ;;  %v203_v4 = vld.sshfl [vmem:[#allocation1 + $0x10] sm:$0xff pattern:$0x73625140] }
  0x1d   : > { %205 = vrot.lane.b32.xlu0 %v199_v3, %s917_s22  ;;  %209 = vrot.lane.b32.xlu1 %v203_v4, %s917_s22  ;;  %v201_v5 = vld.sshfl [vmem:[#allocation1 + $0x8] sm:$0xff pattern:$0x73625140]  ;;  %v193_v34 = vld [vmem:[%s1065_s1] sm:$0xf] }
  0x1e   : > { %252 = vst [vmem:[#allocation1] ss:$4 sm:$0xff] %v192_v2  ;;  %v810_v46 = vld [vmem:[%s1065_s1 + $0x4] sm:$0xf]  ;;  %v821_v4 = vld [vmem:[%s1065_s1 + $0x10] sm:$0xf] }
  0x1f   : > { %v630_v63 = vld [vmem:[%s968_s21 + $0x2] sm:$0xf] }
  0x25   : > { %207 = vrot.lane.b32.xlu0 %v201_v5, %s917_s22  ;;  %v253_v7 = vld.sshfl [vmem:[#allocation1] sm:$0xff pattern:$0x73625140]  ;;  %v254_v8 = vld.sshfl [vmem:[#allocation1 + $0x8] sm:$0xff pattern:$0x73625140] }
  0x26   : > { %292 = vst [vmem:[#allocation1] ss:$4 sm:$0xff] %v288_v6  ;;  %v258_v32 = vsel %vm218_vm1, %v253_v7, 0  ;;  %v260_v33 = vsel %vm218_vm1, %v254_v8, 0 }
  0x27   : > { %269 = vmatpush.bf16.msra.mxu2 %v258_v32  ;;  %282 = vmatpush.bf16.msra.mxu3 %v260_v33  ;;  %v833_v32 = vld [vmem:[%s1065_s1 + $0x20] sm:$0xf] }
  0x2a   : > { %813 = vmatmul.msk.bf16.vlgmr.msra.gmra.mxu2 %vm214_vm2, %v193_v34  ;;  %814 = vmatmul.msk.bf16.vlgmr.msra.gmra.mxu3 %vm214_vm2, %v193_v34 }
  0x2d   : > { %v293_v10 = vld.sshfl [vmem:[#allocation1] sm:$0xff pattern:$0x73625140]  ;;  %v295_v11 = vld.sshfl [vmem:[#allocation1 + $0x8] sm:$0xff pattern:$0x73625140] }
  0x2e   : > { %299 = vrot.lane.b32.xlu1 %v293_v10, %s918_s23  ;;  %v297_v12 = vld.sshfl [vmem:[#allocation1 + $0x10] sm:$0xff pattern:$0x73625140]  ;;  %301 = vrot.lane.b32.xlu2 %v295_v11, %s918_s23 }
  0x2f   : > { %349 = vst [vmem:[#allocation1] ss:$4 sm:$0xff] %v345_v9  ;;  %v824_v11 = vld [vmem:[%s1065_s1 + $0x14] sm:$0xf] }
  0x36   : > { %v354_v14 = vld.sshfl [vmem:[#allocation1 + $0x10] sm:$0xff pattern:$0x73625140]  ;;  %v352_v15 = vld.sshfl [vmem:[#allocation1 + $0x8] sm:$0xff pattern:$0x73625140]  ;;  %303 = vrot.lane.b32.xlu2 %v297_v12, %s918_s23 }
  0x37   : > { %358 = vrot.lane.b32.xlu1 %v352_v15, %s919_s24  ;;  %v350_v16 = vld.sshfl [vmem:[#allocation1] sm:$0xff pattern:$0x73625140]  ;;  %s843_s23 = sshll.u32 %s959_s16, 4 }
  0x38   : > { %356 = vrot.lane.b32.xlu0 %v350_v16, %s919_s24  ;;  %406 = vst [vmem:[#allocation1] ss:$4 sm:$0xff] %v402_v13 }
  0x3e   : > { %360 = vrot.lane.b32.xlu2 %v354_v14, %s919_s24  ;;  %s674_s24 = scalar_lea.vmem [#allocation4], %s843_s23 }
  0x3f   : > { %v409_v18 = vld.sshfl [vmem:[#allocation1 + $0x8] sm:$0xff pattern:$0x73625140]  ;;  %v411_v19 = vld.sshfl [vmem:[#allocation1 + $0x10] sm:$0xff pattern:$0x73625140] }
  0x40   : > { %415 = vrot.lane.b32.xlu1 %v409_v18, %s920_s25  ;;  %v407_v20 = vld.sshfl [vmem:[#allocation1] sm:$0xff pattern:$0x73625140] }
  0x41   : > { %413 = vrot.lane.b32.xlu0 %v407_v20, %s920_s25  ;;  %463 = vst [vmem:[#allocation1] ss:$4 sm:$0xff] %v459_v17 }
  0x46   : > { %417 = vrot.lane.b32.xlu2 %v411_v19, %s920_s25 }
  0x48   : > { %v466_v22 = vld.sshfl [vmem:[#allocation1 + $0x8] sm:$0xff pattern:$0x73625140]  ;;  %v468_v23 = vld.sshfl [vmem:[#allocation1 + $0x10] sm:$0xff pattern:$0x73625140] }
  0x49   : > { %472 = vrot.lane.b32.xlu1 %v466_v22, %s921_s26  ;;  %v464_v24 = vld.sshfl [vmem:[#allocation1] sm:$0xff pattern:$0x73625140] }
  0x4a   : > { %470 = vrot.lane.b32.xlu0 %v464_v24, %s921_s26  ;;  %520 = vst [vmem:[#allocation1] ss:$4 sm:$0xff] %v516_v21 }
  0x4e   : > { %474 = vrot.lane.b32.xlu2 %v468_v23, %s921_s26  ;;  %v827_v23 = vld [vmem:[%s1065_s1 + $0x18] sm:$0xf] }
  0x51   : > { %v523_v26 = vld.sshfl [vmem:[#allocation1 + $0x8] sm:$0xff pattern:$0x73625140]  ;;  %v525_v27 = vld.sshfl [vmem:[#allocation1 + $0x10] sm:$0xff pattern:$0x73625140] }
  0x52   : > { %529 = vrot.lane.b32.xlu1 %v523_v26, %s922_s27  ;;  %v521_v28 = vld.sshfl [vmem:[#allocation1] sm:$0xff pattern:$0x73625140] }
  0x53   : > { %527 = vrot.lane.b32.xlu0 %v521_v28, %s922_s27  ;;  %577 = vst [vmem:[#allocation1] ss:$4 sm:$0xff] %v573_v25 }
  0x56   : > { %531 = vrot.lane.b32.xlu2 %v525_v27, %s922_s27 }
  0x5a   : > { %v580_v29 = vld.sshfl [vmem:[#allocation1 + $0x8] sm:$0xff pattern:$0x73625140]  ;;  %v578_v30 = vld.sshfl [vmem:[#allocation1] sm:$0xff pattern:$0x73625140] }
  0x5b   : > { %586 = vrot.lane.b32.xlu1 %v580_v29, %s923_s28  ;;  %584 = vrot.lane.b32.xlu0 %v578_v30, %s923_s28  ;;  %v582_v31 = vld.sshfl [vmem:[#allocation1 + $0x10] sm:$0xff pattern:$0x73625140] }
  0x5c   : > { %634 = vst [vmem:[#allocation1] ss:$4 sm:$0xff] %v630_v63 }
  0x5e   : > { %588 = vrot.lane.b32.xlu2 %v582_v31, %s923_s28  ;;  %v830_v31 = vld [vmem:[%s1065_s1 + $0x1c] sm:$0xf] }
  0x63   : > { %v636_v13 = vld.sshfl [vmem:[#allocation1 + $0x8] sm:$0xff pattern:$0x73625140]  ;;  %v635_v14 = vld.sshfl [vmem:[#allocation1] sm:$0xff pattern:$0x73625140] }
  0x64   : > { %v642_v18 = vsel %vm218_vm1, %v636_v13, 0  ;;  %v640_v21 = vsel %vm218_vm1, %v635_v14, 0 }
  0x88   : > { %v302_v35 = vpop.permute.xlu2 %301 }
  0x8f   : > { %v206_v36 = vpop.permute.xlu0 %205  ;;  %v210_v38 = vpop.permute.xlu1 %209 }
  0x90   : > { %v304_v37 = vpop.permute.xlu2 %303 }
  0x91   : > { %v307_v39 = vsel %vm305_vm3, %v302_v35, %v304_v37 }
  0x92   : > { %v315_v43 = vsel %vm218_vm1, %v307_v39, 0 }
  0x97   : > { %v208_v40 = vpop.permute.xlu0 %207 }
  0x98   : > { %v212_v41 = vsel %vm211_vm4, %v206_v36, %v208_v40  ;;  %v213_v42 = vsel %vm211_vm4, %v208_v40, %v210_v38  ;;  %v361_v50 = vpop.permute.xlu2 %360 }
  0x99   : > { %v220_v44 = vsel %vm218_vm1, %v212_v41, 0  ;;  %v223_v45 = vsel %vm218_vm1, %v213_v42, 0 }
  0x9a   : > { %232 = vmatpush.bf16.msra.mxu0 %v220_v44  ;;  %245 = vmatpush.bf16.msra.mxu1 %v223_v45 }
  0x9d   : > { %811 = vmatmul.msk.bf16.vlgmr.msra.gmra.mxu0 %vm214_vm2, %v810_v46  ;;  %812 = vmatmul.msk.bf16.vlgmr.msra.gmra.mxu1 %vm214_vm2, %v810_v46 }
  0x9e   : > { %337 = vmatpush.bf16.msrb.mxu1 %v315_v43 }
  0xa0   : > { %v300_v47 = vpop.permute.xlu1 %299  ;;  %v418_v59 = vpop.permute.xlu2 %417 }
  0xa1   : > { %v306_v48 = vsel %vm305_vm3, %v300_v47, %v302_v35 }
  0xa2   : > { %v312_v49 = vsel %vm218_vm1, %v306_v48, 0 }
  0xa3   : > { %324 = vmatpush.bf16.msrb.mxu0 %v312_v49 }
  0xa8   : > { %v475_v3 = vpop.permute.xlu2 %474 }
  0xa9   : > { %v359_v51 = vpop.permute.xlu1 %358 }
  0xaa   : > { %v357_v52 = vpop.permute.xlu0 %356  ;;  %v364_v53 = vsel %vm362_vm5, %v359_v51, %v361_v50 }
  0xab   : > { %v363_v55 = vsel %vm362_vm5, %v357_v52, %v359_v51  ;;  %v372_v56 = vsel %vm218_vm1, %v364_v53, 0 }
  0xac   : > { %v369_v57 = vsel %vm218_vm1, %v363_v55, 0  ;;  %394 = vmatpush.bf16.msrb.mxu3 %v372_v56 }
  0xad   : > { %381 = vmatpush.bf16.msrb.mxu2 %v369_v57  ;;  %816 = vmatmul.msk.bf16.vlgmr.msrb.gmra.mxu0 %vm214_vm2, %v815_v54  ;;  %v271_v33 = vpop.f32.mrf.mxu2  ;;  %v284_v34 = vpop.f32.mrf.mxu3 }
  0xae   : > { %817 = vmatmul.msk.bf16.vlgmr.msrb.gmra.mxu1 %vm214_vm2, %v815_v54 }
  0xaf   : > { %820 = vmatmul.msk.bf16.vlgmr.msrb.gmra.mxu3 %vm214_vm2, %v818_v58 }
  0xb0   : > { %819 = vmatmul.msk.bf16.vlgmr.msrb.gmra.mxu2 %vm214_vm2, %v818_v58  ;;  %v532_v12 = vpop.permute.xlu2 %531 }
  0xb2   : > { %v416_v60 = vpop.permute.xlu1 %415 }
  0xb3   : > { %v421_v61 = vsel %vm419_vm6, %v416_v60, %v418_v59  ;;  %v414_v62 = vpop.permute.xlu0 %413 }
  0xb4   : > { %v429_v0 = vsel %vm218_vm1, %v421_v61, 0  ;;  %v420_v1 = vsel %vm419_vm6, %v414_v62, %v416_v60 }
  0xb5   : > { %v426_v2 = vsel %vm218_vm1, %v420_v1, 0  ;;  %451 = vmatpush.bf16.msra.mxu1 %v429_v0  ;;  %v273_v35 = vpop.f32.mrf.mxu2  ;;  %v286_v36 = vpop.f32.mrf.mxu3 }
  0xb6   : > { %438 = vmatpush.bf16.msra.mxu0 %v426_v2 }
  0xb8   : > { %v589_v24 = vpop.permute.xlu2 %588 }
  0xbb   : > { %v473_v5 = vpop.permute.xlu1 %472 }
  0xbc   : > { %v478_v6 = vsel %vm476_vm7, %v473_v5, %v475_v3  ;;  %v471_v7 = vpop.permute.xlu0 %470 }
  0xbd   : > { %v486_v8 = vsel %vm218_vm1, %v478_v6, 0  ;;  %v477_v9 = vsel %vm476_vm7, %v471_v7, %v473_v5  ;;  %822 = vmatmul.msk.bf16.vlgmr.msra.gmra.mxu0 %vm214_vm2, %v821_v4 }
  0xbe   : > { %v483_v10 = vsel %vm218_vm1, %v477_v9, 0  ;;  %508 = vmatpush.bf16.msra.mxu3 %v486_v8  ;;  %823 = vmatmul.msk.bf16.vlgmr.msra.gmra.mxu1 %vm214_vm2, %v821_v4 }
  0xbf   : > { %495 = vmatpush.bf16.msra.mxu2 %v483_v10 }
  0xc1   : > { %826 = vmatmul.msk.bf16.vlgmr.msra.gmra.mxu3 %vm214_vm2, %v824_v11 }
  0xc2   : > { %825 = vmatmul.msk.bf16.vlgmr.msra.gmra.mxu2 %vm214_vm2, %v824_v11 }
  0xc4   : > { %v530_v15 = vpop.permute.xlu1 %529 }
  0xc5   : > { %v535_v16 = vsel %vm533_vm8, %v530_v15, %v532_v12  ;;  %v528_v17 = vpop.permute.xlu0 %527 }
  0xc6   : > { %v543_v19 = vsel %vm218_vm1, %v535_v16, 0  ;;  %v534_v20 = vsel %vm533_vm8, %v528_v17, %v530_v15 }
  0xc7   : > { %v540_v22 = vsel %vm218_vm1, %v534_v20, 0  ;;  %565 = vmatpush.bf16.msrb.mxu1 %v543_v19 }
  0xc8   : > { %552 = vmatpush.bf16.msrb.mxu0 %v540_v22 }
  0xcb   : > { %664 = vmatpush.bf16.msra.mxu1 %v642_v18 }
  0xcc   : > { %651 = vmatpush.bf16.msra.mxu0 %v640_v21 }
  0xcd   : > { %v587_v25 = vpop.permute.xlu1 %586  ;;  %v585_v26 = vpop.permute.xlu0 %584  ;;  %828 = vmatmul.msk.bf16.vlgmr.msrb.gmra.mxu0 %vm214_vm2, %v827_v23 }
  0xce   : > { %v592_v27 = vsel %vm590_vm9, %v587_v25, %v589_v24  ;;  %v591_v28 = vsel %vm590_vm9, %v585_v26, %v587_v25  ;;  %829 = vmatmul.msk.bf16.vlgmr.msrb.gmra.mxu1 %vm214_vm2, %v827_v23  ;;  %v677_v25 = vld [vmem:[#allocation2] sm:$0xff] }
  0xcf   : > { %v600_v29 = vsel %vm218_vm1, %v592_v27, 0  ;;  %v597_v30 = vsel %vm218_vm1, %v591_v28, 0  ;;  %v684_v27 = vld [vmem:[#allocation3] sm:$0xff] }
  0xd0   : > { %609 = vmatpush.bf16.msrb.mxu2 %v597_v30  ;;  %622 = vmatpush.bf16.msrb.mxu3 %v600_v29 }
  0xd3   : > { %831 = vmatmul.msk.bf16.vlgmr.msrb.gmra.mxu2 %vm214_vm2, %v830_v31  ;;  %832 = vmatmul.msk.bf16.vlgmr.msrb.gmra.mxu3 %vm214_vm2, %v830_v31 }
  0xdd   : > { %834 = vmatmul.msk.bf16.vlgmr.msra.gmra.mxu0 %vm214_vm2, %v833_v32 }
  0xde   : > { %835 = vmatmul.msk.bf16.vlgmr.msra.gmra.mxu1 %vm214_vm2, %v833_v32 }
 0x11a   : > { %v234_v37 = vpop.f32.mrf.mxu0  ;;  %v247_v38 = vpop.f32.mrf.mxu1 }
 0x11b   : > { %v272_v58 = vadd.f32 %v271_v33, %v234_v37  ;;  %v285_v60 = vadd.f32 %v284_v34, %v247_v38 }
 0x122   : > { %v236_v39 = vpop.f32.mrf.mxu0  ;;  %v249_v40 = vpop.f32.mrf.mxu1 }
 0x12a   : > { %v326_v41 = vpop.f32.mrf.mxu0 }
 0x12b   : > { %v339_v42 = vpop.f32.mrf.mxu1  ;;  %v343_v61 = vadd.f32 %v326_v41, %v272_v58 }
 0x12c   : > { %v344_v62 = vadd.f32 %v339_v42, %v285_v60 }
 0x132   : > { %v396_v43 = vpop.f32.mrf.mxu3  ;;  %v328_v44 = vpop.f32.mrf.mxu0 }
 0x133   : > { %v383_v45 = vpop.f32.mrf.mxu2  ;;  %v341_v46 = vpop.f32.mrf.mxu1  ;;  %v401_v0 = vadd.f32 %v396_v43, %v344_v62 }
 0x134   : > { %v400_v63 = vadd.f32 %v383_v45, %v343_v61 }
 0x13a   : > { %v398_v47 = vpop.f32.mrf.mxu3  ;;  %v440_v48 = vpop.f32.mrf.mxu0 }
 0x13b   : > { %v385_v49 = vpop.f32.mrf.mxu2  ;;  %v453_v50 = vpop.f32.mrf.mxu1  ;;  %v457_v2 = vadd.f32 %v440_v48, %v400_v63 }
 0x13c   : > { %v458_v4 = vadd.f32 %v453_v50, %v401_v0 }
 0x142   : > { %v442_v51 = vpop.f32.mrf.mxu0 }
 0x143   : > { %v455_v52 = vpop.f32.mrf.mxu1 }
 0x144   : > { %v510_v53 = vpop.f32.mrf.mxu3 }
 0x145   : > { %v497_v54 = vpop.f32.mrf.mxu2  ;;  %v515_v6 = vadd.f32 %v510_v53, %v458_v4 }
 0x146   : > { %v514_v5 = vadd.f32 %v497_v54, %v457_v2 }
 0x14a   : > { %v554_v55 = vpop.f32.mrf.mxu0 }
 0x14b   : > { %v567_v56 = vpop.f32.mrf.mxu1  ;;  %v571_v9 = vadd.f32 %v554_v55, %v514_v5 }
 0x14c   : > { %v512_v57 = vpop.f32.mrf.mxu3  ;;  %v572_v10 = vadd.f32 %v567_v56, %v515_v6 }
 0x14d   : > { %v499_v59 = vpop.f32.mrf.mxu2 }
 0x152   : > { %v556_v1 = vpop.f32.mrf.mxu0 }
 0x153   : > { %v569_v3 = vpop.f32.mrf.mxu1 }
 0x156   : > { %v611_v7 = vpop.f32.mrf.mxu2  ;;  %v624_v8 = vpop.f32.mrf.mxu3 }
 0x157   : > { %v628_v11 = vadd.f32 %v611_v7, %v571_v9  ;;  %v629_v12 = vadd.f32 %v624_v8, %v572_v10 }
 0x15a   : > { %v653_v13 = vpop.f32.mrf.mxu0 }
 0x15b   : > { %v670_v14 = vadd.f32 %v653_v13, %v628_v11  ;;  %v666_v15 = vpop.f32.mrf.mxu1 }
 0x15c   : > { %v671_v16 = vadd.f32 %v666_v15, %v629_v12 }
 0x15d   : > { %675 = vst [vmem:[%s674_s24] sm:$0xff] %v670_v14  ;;  %v685_v17 = vmul.f32 %v670_v14, %v670_v14 }
 0x15e   : > { %676 = vst [vmem:[%s674_s24 + $0x8] sm:$0xff] %v671_v16  ;;  %v613_v18 = vpop.f32.mrf.mxu2  ;;  %v626_v19 = vpop.f32.mrf.mxu3  ;;  %v678_v20 = vadd.f32 %v671_v16, %v670_v14  ;;  %v686_v21 = vmul.f32 %v671_v16, %v671_v16 }
 0x160   : > { %679 = vadd.xlane.f32.xlu0 %v678_v20  ;;  %v687_v22 = vadd.f32 %v686_v21, %v685_v17 }
 0x162   : > { %688 = vadd.xlane.f32.xlu1 %v687_v22  ;;  %v655_v23 = vpop.f32.mrf.mxu0 }
 0x163   : > { %v668_v24 = vpop.f32.mrf.mxu1 }
 0x1d3   : > { %v680_v26 = vpop.xlane.xlu0 %679 }
 0x1d4   : > { %v681_v28 = vadd.f32 %v680_v26, %v677_v25  ;;  %695 = sbr.rel (%p838_p5) target bundleno = 649 (0x289), region = 44 }
 0x1d5   : > { %v689_v29 = vpop.xlane.xlu1 %688 }
 0x1d6   : > { %683 = vst.msk [vmem:[#allocation2] sm:$0xff] %vm682_vm10, %v681_v28  ;;  %v690_v30 = vadd.f32 %v689_v29, %v684_v27 }
 0x1d8   : > { %691 = vst.msk [vmem:[#allocation3] sm:$0xff] %vm682_vm10, %v690_v30 }
 0x1d9   : > { %v924_v31 = vmov 0   ;;  %v925_v32 = vmov 512.0   ;;  %v721_v53 = vld [vmem:[%s1066_s2] sm:$0xff]  ;;  %v726_v60 = vld [vmem:[#allocation4] sm:$0xff]  ;;  %v728_v62 = vld [vmem:[#allocation4 + $0x10] sm:$0xff] }
 0x1da   : > { %871 = vset.pattern.permute.xlu0 %v924_v31  ;;  %872 = vrcp.f32 %v925_v32  ;;  %v723_v57 = vld [vmem:[%s1067_s3] sm:$0xff]  ;;  %v729_v63 = vld [vmem:[#allocation4 + $0x18] sm:$0xff] }
 0x1db   : > { %v727_v61 = vld [vmem:[#allocation4 + $0x8] sm:$0xff] }
 0x1dd   : > { %v696_v37 = vld [vmem:[#allocation2] sm:$0xff] }
 0x1df   : > { %v705_v39 = vld [vmem:[#allocation3] sm:$0xff] }
 0x1e0   : > { %v873_v33 = vpop.eup %872 }
 0x1e1   : > { %v698_v34 = vmul.f32 512.0, %v873_v33  ;;  %vm702_vm11 = vweird.f32 %v873_v33 }
 0x1e3   : > { %v699_v35 = vsub.f32 1.0, %v698_v34 }
 0x1e5   : > { %v700_v36 = vmul.f32 %v873_v33, %v699_v35 }
 0x1e7   : > { %v701_v38 = vadd.f32 %v873_v33, %v700_v36 }
 0x1e9   : > { %v703_v40 = vsel %vm702_vm11, %v873_v33, %v701_v38 }
 0x1ea   : > { %v704_v41 = vmul.f32 %v703_v40, %v696_v37  ;;  %v706_v42 = vmul.f32 %v705_v39, %v703_v40 }
 0x1ec   : > { %v707_v43 = vmul.f32 %v704_v41, %v704_v41 }
 0x1ee   : > { %v708_v44 = vsub.f32 %v706_v42, %v707_v43 }
 0x1f0   : > { %v709_v45 = vmax.f32 %v708_v44, 0.0 }
 0x1f2   : > { %v710_v46 = vadd.f32 1e-05, %v709_v45 }
 0x1f4   : > { %874 = vrsqrt.f32 %v710_v46  ;;  %vm717_vm12 = vweird.f32 %v710_v46 }
 0x1fa   : > { %v875_v47 = vpop.eup %874 }
 0x1fb   : > { %v712_v48 = vmul.f32 %v875_v47, %v710_v46  ;;  %vm718_vm13 = vweird.f32 %v875_v47 }
 0x1fc   : > { %vm719_vm14 = vmor %vm717_vm12, %vm718_vm13 }
 0x1fd   : > { %v713_v49 = vmul.f32 %v875_v47, %v712_v48 }
 0x1ff   : > { %v714_v50 = vmul.f32 0.5, %v713_v49 }
 0x201   : > { %v715_v51 = vsub.f32 1.5, %v714_v50 }
 0x203   : > { %v716_v52 = vmul.f32 %v875_v47, %v715_v51 }
 0x205   : > { %v720_v54 = vsel %vm719_vm14, %v875_v47, %v716_v52 }
 0x206   : > { %v722_v55 = vmul.f32 %v721_v53, %v720_v54 }
 0x208   : > { %732 = vperm.xlu0 %871, %v722_v55   ;;  %v724_v56 = vmul.f32 %v722_v55, %v704_v41 }
 0x20a   : > { %v725_v58 = vsub.f32 %v723_v57, %v724_v56 }
 0x210   : > { %741 = vperm.xlu0 %871, %v725_v58  }
 0x27a   : > { %v733_v59 = vpop.permute.xlu0 %732 }
 0x27b   : > { %v735_v0 = vmul.f32 %v733_v59, %v726_v60  ;;  %v736_v1 = vmul.f32 %v733_v59, %v727_v61  ;;  %v737_v2 = vmul.f32 %v733_v59, %v728_v62  ;;  %v738_v3 = vmul.f32 %v733_v59, %v729_v63 }
 0x282   : > { %v742_v4 = vpop.permute.xlu0 %741 }
 0x283   : > { %v744_v5 = vadd.f32 %v742_v4, %v735_v0  ;;  %v745_v6 = vadd.f32 %v742_v4, %v736_v1  ;;  %v746_v7 = vadd.f32 %v742_v4, %v737_v2  ;;  %v747_v8 = vadd.f32 %v742_v4, %v738_v3 }
 0x285   : > { %748 = vst [vmem:[#allocation4] sm:$0xff] %v744_v5 }
 0x286   : > { %749 = vst [vmem:[#allocation4 + $0x8] sm:$0xff] %v745_v6 }
 0x287   : > { %750 = vst [vmem:[#allocation4 + $0x10] sm:$0xff] %v746_v7 }
 0x288   : > { %751 = vst [vmem:[#allocation4 + $0x18] sm:$0xff] %v747_v8 }
 0x289 PF: > { %p849_p6 = scmp.eq.s32.totalorder %s959_s16, 1  ;;  %s926_s30 = smov [#allocation4]  }
 0x28a   : > { %s757_s5 = sshll.u32 %s926_s30, 4  ;;  %s759_s8 = sshll.u32 %s1068_s4, 4  ;;  %s758_s5 = int_to_ptr.vmem [resolvable:$true] %s757_s5  ;;  %s760_s8 = int_to_ptr.hbm [resolvable:$true] %s759_s8 }
 0x28b   : > { %s927_s9 = smov 256  }
 0x28c   : > { %846 = dma.vmem_to_hbm [thread:$0]  (%p849_p6), %s758_s5, 512, %s760_s8, [#allocation5], %s927_s9, %s927_s9, %s923_s28  }
 0x28d   : > { %909 = dma.done.wait (%p849_p6), [#allocation5], 512  }
 0x28e   : > { %911 = vsyncadd (%p849_p6), [#allocation5], 4294966784 }
 0x28f PF: > { %s15_s15 = sadd.s32 1, %s914_s15  }
 0x290   : > { %p12_p7 = scmp.ge.s32.totalorder %s15_s15, 4  }
 0x292   :  { %14 = sbr.rel (!%p12_p7) target bundleno = 1 (0x1), region = 80 }
 0x297   :  { %776 = vsyncpa [#allocation5], 1 }
 0x298   :  { %778 = vsyncpa [#allocation5 + $0x1], 1 }

</bundles_post_ra>
